<compile_context>
chip_gen: v5e
topology: v5e:2x2
jax: 0.10.0
libtpu: 0.0.40
codegen_flags: <defaults>
</compile_context>

<pallas_src>
import jax
import jax.numpy as jnp
from jax.experimental import pallas as pl
from jax.experimental.pallas import tpu as pltpu


def signnet_kernel(x_ref, w1_ref, b1_ref, w2_ref, b2_ref, o_ref):
    # Layer 1 for ALL components at once; normalization already folded into W1/b1.
    x = x_ref[...].astype(jnp.bfloat16)                                   # MXU-native operand
    h = jnp.tanh(
        jnp.dot(x, w1_ref[...], preferred_element_type=jnp.float32)      # [tn, C*H] f32 acc
        + b1_ref[...]                                                     # [1, C*H] f32
    )
    # Block-diagonal layer 2 -> already-concatenated output [tn, C*D_out].
    y = jnp.dot(h.astype(jnp.bfloat16), w2_ref[...],
                preferred_element_type=jnp.float32) + b2_ref[...]
    # SignNet epilogue: sigmoid (EUP), f32.
    o_ref[...] = jax.nn.sigmoid(y).astype(o_ref.dtype)


def pack_signnet_params(in_mean, in_std, w1, b1, w2, b2):
    """One-time weight re-layout -- call once, NOT on the per-forward path.

    w1 [C, D_in, H], b1 [C, 1, H], w2 [C, H, D_out], b2 [C, 1, D_out],
    in_mean/in_std [1, D_in].

    Folds (x - mean)/std into layer 1:
        ((x-mean)/std) @ W1 + b1 == x @ (W1/std[:,None]) + (b1 - mean @ (W1/std[:,None]))
    and packs the C components so two matmuls produce the already-concatenated
    [N, C*D_out] slab (torch.cat(dim=1) layout for free).
    """
    C, D_in, H = w1.shape
    D_out = w2.shape[-1]

    inv_std = (1.0 / in_std.astype(jnp.float32)).reshape(D_in)
    mean = in_mean.astype(jnp.float32).reshape(D_in)

    w1f = w1.astype(jnp.float32) * inv_std[None, :, None]                 # [C, D_in, H]
    b1f = b1.astype(jnp.float32).reshape(C, H) - jnp.einsum('d,cdh->ch', mean, w1f)

    # Component c occupies columns [c*H, (c+1)*H) / [c*D_out, (c+1)*D_out).
    w1p = jnp.transpose(w1f, (1, 0, 2)).reshape(D_in, C * H)              # [D_in, C*H]
    b1p = b1f.reshape(1, C * H)                                           # [1, C*H]

    eye = jnp.eye(C, dtype=jnp.float32)
    w2f = w2.astype(jnp.float32)
    w2p = (eye[:, None, :, None] * w2f[:, :, None, :]).reshape(C * H, C * D_out)
    b2p = b2.astype(jnp.float32).reshape(1, C * D_out)                    # [1, C*D_out]

    # bf16 weights: single-pass MXU and half the weight DMA bytes; biases stay
    # f32 (added on the VPU to the f32 matmul accumulators).
    return (w1p.astype(jnp.bfloat16), b1p, w2p.astype(jnp.bfloat16), b2p)


def signnet_forward(x, packed, *, tile_n=2048):
    """x: [N, D_in] f32.  packed = pack_signnet_params(...).  Returns sigmoid(concat) [N, C*D_out] f32."""
    w1p, b1p, w2p, b2p = packed
    N, D_in = x.shape
    CH = w1p.shape[1]
    CD = w2p.shape[1]

    # Sublane-aligned batch tile.  The ragged last block (if any) simply
    # overhangs the array: Pallas masks its out-of-bounds reads and drops the
    # out-of-bounds writes, so there is no jnp.pad / out[:N] HBM pass.
    tn = min(tile_n, N)
    if tn % 8 != 0:
        tn = N if N < 8 else (tn // 8) * 8    # N < 8: full-dim block is always legal
    grid_n = pl.cdiv(N, tn)

    cost = pl.CostEstimate(
        flops=2 * N * (D_in * CH + CH * CD),
        transcendentals=N * (CH + CD),                       # tanh + sigmoid
        bytes_accessed=(N * D_in * 4 + N * CD * 4            # x in, out
                        + w1p.size * 2 + w2p.size * 2        # bf16 weights
                        + (CH + CD) * 4),                    # f32 biases
    )

    return pl.pallas_call(
        signnet_kernel,
        out_shape=jax.ShapeDtypeStruct((N, CD), jnp.float32),
        grid_spec=pltpu.PrefetchScalarGridSpec(
            num_scalar_prefetch=0,
            grid=(grid_n,),
            in_specs=[
                pl.BlockSpec((tn, D_in), lambda i: (i, 0)),   # x tile (f32)
                pl.BlockSpec((D_in, CH), lambda i: (0, 0)),   # packed W1 (bf16, grid-invariant)
                pl.BlockSpec((1, CH),    lambda i: (0, 0)),   # packed b1 (f32)
                pl.BlockSpec((CH, CD),   lambda i: (0, 0)),   # block-diag W2 (bf16)
                pl.BlockSpec((1, CD),    lambda i: (0, 0)),   # packed b2 (f32)
            ],
            out_specs=pl.BlockSpec((tn, CD), lambda i: (i, 0)),
        ),
        compiler_params=pltpu.CompilerParams(
            dimension_semantics=("parallel",),                # batch axis -> 2-TC split on v7x
            vmem_limit_bytes=32 * 1024 * 1024,
        ),
        cost_estimate=cost,
    )(x, w1p, b1p, w2p, b2p)


def reference_forward(x, in_mean, in_std, w1, b1, w2, b2):
    xn = (x - in_mean) / in_std
    outs = []
    for c in range(w1.shape[0]):
        h = jnp.tanh(xn @ w1[c] + b1[c])
        outs.append(h @ w2[c] + b2[c])
    return jax.nn.sigmoid(jnp.concatenate(outs, axis=1))


if __name__ == "__main__":
    # Small deterministic shapes consistent with the module:
    # C=3 components, each Linear(8, 32) -> Tanh -> Linear(32, 4); batch 20
    # (deliberately NOT a multiple of the 8-row sublane tile, to exercise the
    # pad-free ragged-tail handling).
    N, D_in, H, D_out, C = 20, 8, 32, 4, 3

    key = jax.random.PRNGKey(0)
    keys = jax.random.split(key, 7)

    x = jax.random.normal(keys[0], (N, D_in), jnp.float32)
    in_mean = jax.random.normal(keys[1], (1, D_in), jnp.float32) * 0.1
    in_std = 1.0 + 0.1 * jax.random.uniform(keys[2], (1, D_in), jnp.float32)
    w1 = jax.random.normal(keys[3], (C, D_in, H), jnp.float32) * 0.2
    b1 = jax.random.normal(keys[4], (C, 1, H), jnp.float32) * 0.05
    w2 = jax.random.normal(keys[5], (C, H, D_out), jnp.float32) * 0.2
    b2 = jax.random.normal(keys[6], (C, 1, D_out), jnp.float32) * 0.05

    # One-time packing, hoisted out of the per-call path.
    packed = pack_signnet_params(in_mean, in_std, w1, b1, w2, b2)
    packed = tuple(jax.block_until_ready(p) for p in packed)

    y = signnet_forward(x, packed)
    y = jax.block_until_ready(y)

    y_ref = reference_forward(x, in_mean, in_std, w1, b1, w2, b2)
    assert y.shape == (N, C * D_out)
    # bf16 MXU operands with f32 accumulation: allow a bf16-sized tolerance
    # (outputs are sigmoids in (0,1); a real packing bug would be O(0.1+) off).
    assert jnp.allclose(y, y_ref, atol=2e-2, rtol=0.0), (
        float(jnp.max(jnp.abs(y - y_ref))))

    print("KERNEL_OK")
</pallas_src>

<mosaic_0001>
module attributes {stable_mosaic.version = 11 : i64} {
  func.func @signnet_kernel(%arg0: i32, %arg1: memref<16x8xf32, #tpu.memory_space<vmem>>, %arg2: memref<8x96xbf16, #tpu.memory_space<vmem>>, %arg3: memref<1x96xf32, #tpu.memory_space<vmem>>, %arg4: memref<96x12xbf16, #tpu.memory_space<vmem>>, %arg5: memref<1x12xf32, #tpu.memory_space<vmem>>, %arg6: memref<16x12xf32, #tpu.memory_space<vmem>>) attributes {dimension_semantics = [#tpu.dimension_semantics<parallel>], iteration_bounds = array<i64: 2>, scalar_prefetch = 0 : i64, scratch_operands = 0 : i64, tpu.core_type = #tpu.core_type<tc>, window_params = [{transform_indices = @transform_0, window_bounds = array<i64: 16, 8>}, {pipeline_mode = #tpu.pipeline_mode<synchronous>, transform_indices = @transform_1, window_bounds = array<i64: 8, 96>}, {pipeline_mode = #tpu.pipeline_mode<synchronous>, transform_indices = @transform_2, window_bounds = array<i64: 1, 96>}, {pipeline_mode = #tpu.pipeline_mode<synchronous>, transform_indices = @transform_3, window_bounds = array<i64: 96, 12>}, {pipeline_mode = #tpu.pipeline_mode<synchronous>, transform_indices = @transform_4, window_bounds = array<i64: 1, 12>}, {transform_indices = @transform_5, window_bounds = array<i64: 16, 12>}]} {
    %c0 = arith.constant 0 : index
    %c0_0 = arith.constant 0 : index
    %0 = vector.load %arg1[%c0, %c0_0] : memref<16x8xf32, #tpu.memory_space<vmem>>, vector<16x8xf32>
    %1 = arith.truncf %0 : vector<16x8xf32> to vector<16x8xbf16>
    %c0_1 = arith.constant 0 : index
    %c0_2 = arith.constant 0 : index
    %2 = vector.load %arg2[%c0_1, %c0_2] : memref<8x96xbf16, #tpu.memory_space<vmem>>, vector<8x96xbf16>
    %cst = arith.constant dense<0.000000e+00> : vector<16x96xf32>
    %3 = tpu.matmul %1, %2, %cst {dimension_numbers = #tpu.dot_dimension_numbers<[1], [0], [0], [1], [0, 0, 1, 1], [], []>} : vector<16x8xbf16>, vector<8x96xbf16>, vector<16x96xf32> -> vector<16x96xf32>
    %c0_3 = arith.constant 0 : index
    %c0_4 = arith.constant 0 : index
    %4 = vector.load %arg3[%c0_3, %c0_4] : memref<1x96xf32, #tpu.memory_space<vmem>>, vector<1x96xf32>
    %5 = vector.broadcast %4 : vector<1x96xf32> to vector<16x96xf32>
    %6 = arith.addf %3, %5 : vector<16x96xf32>
    %7 = math.tanh %6 : vector<16x96xf32>
    %8 = arith.truncf %7 : vector<16x96xf32> to vector<16x96xbf16>
    %c0_5 = arith.constant 0 : index
    %c0_6 = arith.constant 0 : index
    %9 = vector.load %arg4[%c0_5, %c0_6] : memref<96x12xbf16, #tpu.memory_space<vmem>>, vector<96x12xbf16>
    %cst_7 = arith.constant dense<0.000000e+00> : vector<16x12xf32>
    %10 = tpu.matmul %8, %9, %cst_7 {dimension_numbers = #tpu.dot_dimension_numbers<[1], [0], [0], [1], [0, 0, 1, 1], [], []>} : vector<16x96xbf16>, vector<96x12xbf16>, vector<16x12xf32> -> vector<16x12xf32>
    %c0_8 = arith.constant 0 : index
    %c0_9 = arith.constant 0 : index
    %11 = vector.load %arg5[%c0_8, %c0_9] : memref<1x12xf32, #tpu.memory_space<vmem>>, vector<1x12xf32>
    %12 = vector.broadcast %11 : vector<1x12xf32> to vector<16x12xf32>
    %13 = arith.addf %10, %12 : vector<16x12xf32>
    %14 = arith.negf %13 : vector<16x12xf32>
    %15 = math.exp %14 : vector<16x12xf32>
    %cst_10 = arith.constant 1.000000e+00 : f32
    %16 = vector.broadcast %cst_10 : f32 to vector<16x12xf32>
    %17 = arith.addf %16, %15 : vector<16x12xf32>
    %18 = arith.divf %16, %17 : vector<16x12xf32>
    %c0_11 = arith.constant 0 : index
    %c0_12 = arith.constant 0 : index
    %19 = vector.load %arg6[%c0_11, %c0_12] : memref<16x12xf32, #tpu.memory_space<vmem>>, vector<16x12xf32>
    tpu.vector_store %arg6[%c0_11, %c0_12], %18 {strides = array<i32>} : memref<16x12xf32, #tpu.memory_space<vmem>>, vector<16x12xf32>,
    return
  }
  func.func @transform_0(%arg0: i32) -> (i32, i32) {
    %c0_i32 = arith.constant 0 : i32
    %c0_i32_0 = arith.constant 0 : i32
    return %arg0, %c0_i32 : i32, i32
  }
  func.func @transform_1(%arg0: i32) -> (i32, i32) {
    %c0_i32 = arith.constant 0 : i32
    %c0_i32_0 = arith.constant 0 : i32
    %c0_i32_1 = arith.constant 0 : i32
    return %c0_i32, %c0_i32_0 : i32, i32
  }
  func.func @transform_2(%arg0: i32) -> (i32, i32) {
    %c0_i32 = arith.constant 0 : i32
    %c0_i32_0 = arith.constant 0 : i32
    %c0_i32_1 = arith.constant 0 : i32
    return %c0_i32, %c0_i32_0 : i32, i32
  }
  func.func @transform_3(%arg0: i32) -> (i32, i32) {
    %c0_i32 = arith.constant 0 : i32
    %c0_i32_0 = arith.constant 0 : i32
    %c0_i32_1 = arith.constant 0 : i32
    return %c0_i32, %c0_i32_0 : i32, i32
  }
  func.func @transform_4(%arg0: i32) -> (i32, i32) {
    %c0_i32 = arith.constant 0 : i32
    %c0_i32_0 = arith.constant 0 : i32
    %c0_i32_1 = arith.constant 0 : i32
    return %c0_i32, %c0_i32_0 : i32, i32
  }
  func.func @transform_5(%arg0: i32) -> (i32, i32) {
    %c0_i32 = arith.constant 0 : i32
    %c0_i32_0 = arith.constant 0 : i32
    return %arg0, %c0_i32 : i32, i32
  }
}

</mosaic_0001>

<bundles_post_ra>
// kernel: tpu_custom_call.1
= control target key start
LH: loop header
LB: loop body
LE: loop exit
PB: predicated region body
PF: predicated region fallthrough
CT: control target
= control target key end

     0   :  { %s892_s18 = smov 0   ;;  %s894_s19 = smov 0   ;;  %s1004_s0 = inlined_call_operand.vmem [shape: f32[20,8], index: 0, kind: input, shape index: {}]   ;;  %s1005_s1 = inlined_call_operand.vmem [shape: bf16[8,96], index: 1, kind: input, shape index: {}]   ;;  %s1006_s2 = inlined_call_operand.vmem [shape: f32[1,96], index: 2, kind: input, shape index: {}]   ;;  %s1007_s3 = inlined_call_operand.vmem [shape: bf16[96,12], index: 3, kind: input, shape index: {}]   ;;  %s1008_s4 = inlined_call_operand.vmem [shape: f32[1,12], index: 4, kind: input, shape index: {}]   ;;  %s1009_s5 = inlined_call_operand.vmem [shape: f32[20,12], index: 5, kind: output, shape index: {}]  }
   0x1   :  { %s896_s20 = smov 0  }
   0x2 LB: > { %s905_s21 = sadd.s32 4294967295, %s828_s20   ;;  %s907_s22 = sadd.s32 1, %s828_s20   ;;  %s828_s20 = sphi %s896_s20, %s1013_s20   ;;  %s824_s19 = sphi %s894_s19, %s1012_s19   ;;  %s820_s18 = sphi %s892_s18, %s1011_s18  }
   0x3   : > { %s129_s23 = ssub.s32 %s828_s20, %s907_s22  ;;  %s132_s24 = sadd.s32 1, %s824_s19 }
   0x4   : > { %p130_p0 = scmp.eq.s32.totalorder %s129_s23, 0  ;;  %p142_p1 = scmp.ne.s32.totalorder %s824_s19, %s820_s18 }
   0x5   : > { %p143_p2 = scmp.eq.s32.totalorder %s905_s21, 1  ;;  %p614_p3 = scmp.ge.s32.totalorder %s828_s20, 1 }
   0x6   : > { %s915_s25 = scalar_select %p130_p0, %s824_s19, %s132_s24  }
   0x7   : > { %p917_p4 = por %p143_p2, %p142_p1  ;;  %p196_p5 = scmp.lt.s32.totalorder %s828_s20, 3 }
   0x9   : > { %p197_p6 = pnand %p614_p3, %p196_p5 }
   0xa   : > { %s925_s29 = sshll.u32 (!%p197_p6), %s905_s21, 1 }
   0xb   : > { %200 = sbr.rel (%p197_p6) target bundleno = 372 (0x174), region = 40  ;;  %p232_p7 = scmp.lt.s32.totalorder (!%p197_p6), %s925_s29, 2 }
  0x10   : > { %v250_v0 = vld [vmem:[%s1005_s1] sm:$0xf]  ;;  %vm259_vm0 = vcmask 1043456   ;;  %v668_v1 = vld [vmem:[%s1007_s3 + $0x28] sm:$0xff]  ;;  %s233_s7 = scalar_select %p232_p7, %s925_s29, 2  ;;  %vm255_vm1 = vcmask 64512  }
  0x11   : > { %v261_v2 = vsel %vm259_vm0, %v250_v0, 0  ;;  %338 = vmatpush.bf16.msra.mxu1 %v668_v1  ;;  %v667_v6 = vld [vmem:[%s1007_s3 + $0x20] sm:$0xff]  ;;  %v666_v7 = vld [vmem:[%s1007_s3 + $0x18] sm:$0xff]  ;;  %v665_v8 = vld [vmem:[%s1007_s3 + $0x10] sm:$0xff]  ;;  %vm332_vm2 = vcmask 785408   ;;  %vm388_vm6 = vcmask 97280  }
  0x12   : > { %270 = vmatpush.bf16.msra.mxu0 %v261_v2  ;;  %s617_s8 = sshll.u32 %s233_s7, 3  ;;  %v664_v9 = vld [vmem:[%s1007_s3 + $0x8] sm:$0xff]  ;;  %v663_v10 = vld [vmem:[%s1007_s3] sm:$0xff] }
  0x13   : > { %s235_s11 = scalar_lea.vmem %s1004_s0, %s617_s8  ;;  %v760_v12 = vld [vmem:[%s1006_s2] ss:$0 sm:$0xff]  ;;  %s224_s8 = sand.u32 1, %s820_s18  }
  0x14   : > { %v247_v3 = vld [vmem:[%s235_s11] sm:$0xff]  ;;  %v248_v4 = vld [vmem:[%s235_s11 + $0x8] sm:$0xff]  ;;  %s615_s9 = sshll.u32 %s224_s8, 4  ;;  %s399_s18 = ssub.s32 (%p917_p4), 3, %s925_s29 }
  0x15   : > { %v249_v5 = vpack.c.bf16 %v248_v4, %v247_v3  ;;  %339 = vmatpush.bf16.msra.mxu1 %v667_v6  ;;  %v761_v19 = vld [vmem:[%s1008_s4] ss:$0 sm:$0xff]  ;;  %s957_s10 = scalar_lea.vmem [#allocation2], %s615_s9   ;;  %s669_s11 = sshll.u32 (%p917_p4), %s905_s21, 4 }
  0x16   : > { %p400_p8 = scmp.lt.s32.totalorder (%p917_p4), %s399_s18, 2  ;;  %s970_s14 = scalar_lea.vmem (%p917_p4), %s1009_s5, %s669_s11  }
  0x17   : > { %618 = vmatmul.msk.bf16.vlgmr.msra.gmra.mxu0 %vm255_vm1, %v249_v5 }
  0x19   : > { %340 = vmatpush.bf16.msra.mxu1 %v666_v7 }
  0x1d   : > { %341 = vmatpush.bf16.msra.mxu1 %v665_v8 }
  0x21   : > { %342 = vmatpush.bf16.msra.mxu1 %v664_v9 }
  0x25   : > { %343 = vmatpush.bf16.msra.mxu1 %v663_v10 }
  0x94   : > { %v272_v11 = vpop.f32.mrf.mxu0 }
  0x95   : > { %v273_v13 = vadd.f32 %v760_v12, %v272_v11 }
  0x97   : > { %762 = vtanh.f32 %v273_v13 }
  0x9c   : > { %v274_v14 = vpop.f32.mrf.mxu0 }
  0x9d   : > { %v275_v15 = vadd.f32 %v760_v12, %v274_v14  ;;  %v763_v16 = vpop.eup %762 }
  0x9f   : > { %764 = vtanh.f32 %v275_v15 }
  0xa5   : > { %v765_v17 = vpop.eup %764 }
  0xa6   : > { %v279_v18 = vpack.c.bf16 %v765_v17, %v763_v16 }
  0xa8   : > { %643 = vmatmul.msk.bf16.vlgmr.msra.gmra.mxu1 %vm332_vm2, %v279_v18 }
 0x125   : > { %v345_v20 = vpop.f32.mrf.mxu1 }
 0x126   : > { %v346_v21 = vadd.f32 %v761_v19, %v345_v20 }
 0x128   : > { %v644_v22 = vmul.f32 -1.442695, %v346_v21 }
 0x12a   : > { %766 = vpow2.f32 %v644_v22 }
 0x12d   : > { %v347_v23 = vpop.f32.mrf.mxu1 }
 0x12e   : > { %v348_v24 = vadd.f32 %v761_v19, %v347_v23 }
 0x130   : > { %v767_v25 = vpop.eup %766  ;;  %v645_v26 = vmul.f32 -1.442695, %v348_v24 }
 0x131   : > { %v356_v27 = vadd.f32 1.0, %v767_v25 }
 0x132   : > { %768 = vpow2.f32 %v645_v26 }
 0x133   : > { %770 = vrcp.f32 %v356_v27  ;;  %v369_v33 = vand.u32 2147483648, %v356_v27  ;;  %v367_v35 = vand.u32 2147483647, %v356_v27  ;;  %vm363_vm4 = vweird.f32 %v356_v27 }
 0x135   : > { %v370_v38 = vor.u32 1.1754944e-38, %v369_v33  ;;  %vm368_vm7 = vcmp.eq.f32.partialorder %v367_v35, 8.507059e+37 }
 0x138   : > { %v769_v28 = vpop.eup %768 }
 0x139   : > { %v771_v29 = vpop.eup %770  ;;  %v357_v30 = vadd.f32 1.0, %v769_v28 }
 0x13a   : > { %v359_v31 = vmul.f32 %v771_v29, %v356_v27  ;;  %vm364_vm3 = vweird.f32 %v771_v29 }
 0x13b   : > { %772 = vrcp.f32 %v357_v30  ;;  %vm365_vm5 = vmor %vm363_vm4, %vm364_vm3  ;;  %v384_v43 = vand.u32 2147483648, %v357_v30  ;;  %v382_v45 = vand.u32 2147483647, %v357_v30  ;;  %vm378_vm9 = vweird.f32 %v357_v30 }
 0x13c   : > { %v360_v32 = vsub.f32 1.0, %v359_v31 }
 0x13d   : > { %v385_v47 = vor.u32 1.1754944e-38, %v384_v43  ;;  %vm383_vm11 = vcmp.eq.f32.partialorder %v382_v45, 8.507059e+37 }
 0x13e   : > { %v361_v34 = vmul.f32 %v771_v29, %v360_v32 }
 0x140   : > { %v362_v36 = vadd.f32 %v771_v29, %v361_v34 }
 0x141   : > { %v773_v37 = vpop.eup %772 }
 0x142   : > { %v366_v39 = vsel %vm365_vm5, %v771_v29, %v362_v36  ;;  %v374_v40 = vmul.f32 %v773_v37, %v357_v30  ;;  %vm379_vm8 = vweird.f32 %v773_v37 }
 0x143   : > { %v371_v41 = vsel %vm368_vm7, %v370_v38, %v366_v39  ;;  %vm380_vm10 = vmor %vm378_vm9, %vm379_vm8 }
 0x144   : > { %389 = vst.msk [vmem:[%s957_s10] sm:$0xff] %vm388_vm6, %v371_v41  ;;  %v375_v42 = vsub.f32 1.0, %v374_v40 }
 0x146   : > { %v376_v44 = vmul.f32 %v773_v37, %v375_v42 }
 0x148   : > { %v377_v46 = vadd.f32 %v773_v37, %v376_v44  ;;  %397 = sbr.rel (!%p917_p4) target bundleno = 372 (0x174), region = 44 }
 0x14a   : > { %v381_v48 = vsel %vm380_vm10, %v773_v37, %v377_v46 }
 0x14b   : > { %v386_v49 = vsel %vm383_vm11, %v385_v47, %v381_v48 }
 0x14c   : > { %390 = vst.msk [vmem:[%s957_s10 + $0x8] sm:$0xff] %vm388_vm6, %v386_v49 }
 0x14d   : > { %s1015_s18 = smov (!%p400_p8, %s399_s18), 2 }
 0x14e   : > { %s648_s15 = sshll.u32 %s1015_s18, 3 }
 0x14f   : > { %p651_p9 = scmp.eq.s32.totalorder %s648_s15, 0 }
 0x150   : > { %s976_s16 = sshrl.u32 (!%p651_p9), %s1015_s18, 1 }
 0x151   : > { %408 = sbr.rel (%p651_p9) target bundleno = 372 (0x174), region = 48  ;;  %p652_p10 = scmp.le.s32.totalorder (!%p651_p9), %s976_s16, 0 }
 0x156   : > { %567 = sbr.rel (%p652_p10) target bundleno = 355 (0x163), region = 124  ;;  %s830_s21 = smov (!%p652_p10), %s970_s14  }
 0x157   : > { %s834_s26 = smov (!%p652_p10), %s957_s10   ;;  %s838_s29 = smov (!%p652_p10), 0  }
 0x158   : > { %s842_s17 = smov (!%p652_p10), 0  }
 0x15b LB: >> { %v473_v50 = vld [vmem:[%s836_s26] sm:$0xff]  ;;  %v475_v51 = vld [vmem:[%s836_s26 + $0x8] sm:$0xff]  ;;  %s477_s20 = sadd.s32 1, %s840_s29  ;;  %s467_s17 = sadd.s32 1, %s844_s17   ;;  %s844_s17 = sphi %s842_s17, %s467_s17   ;;  %s840_s29 = sphi %s838_s29, %s839_s29   ;;  %s836_s26 = sphi %s834_s26, %s482_s26   ;;  %s832_s21 = sphi %s830_s21, %s483_s21  }
 0x15c   : >> { %474 = vst [vmem:[%s832_s21] sm:$0xff] %v473_v50  ;;  %p478_p11 = scmp.ge.s32.totalorder %s477_s20, %s976_s16  ;;  %p466_p12 = scmp.ge.s32.totalorder %s467_s17, %s976_s16 }
 0x15d   : >> { %476 = vst [vmem:[%s832_s21 + $0x8] sm:$0xff] %v475_v51 }
 0x15e   : >> { %s1017_s20 = smov (%p478_p11, %s477_s20), 0  ;;  %469 = sbr.rel (!%p466_p12) target bundleno = 347 (0x15b), region = 130 }
 0x15f   : >> { %s653_s23 = sshll.u32 %s1017_s20, 4  ;;  %s839_s29 = smov %s1017_s20  }
 0x160   : >> { %s482_s26 = scalar_lea.vmem %s957_s10, %s653_s23 [#allocation2]   ;;  %s483_s21 = scalar_lea.vmem %s970_s14, %s653_s23  }
 0x163 PF: > { %s986_s24 = sand.u32 1, %s1015_s18   ;;  %s670_s27 = sshll.u32 %s976_s16, 4 }
 0x164   : > { %s488_s28 = scalar_lea.vmem %s957_s10, %s670_s27 [#allocation2]   ;;  %s490_s30 = scalar_lea.vmem %s970_s14, %s670_s27  }
 0x165   : > { %p658_p13 = scmp.le.s32.totalorder %s986_s24, 0 }
 0x166   : > { %s846_s6 = smov (!%p658_p13), %s490_s30   ;;  %s850_s7 = smov (!%p658_p13), %s488_s28  }
 0x167   : > { %581 = sbr.rel (%p658_p13) target bundleno = 372 (0x174), region = 135  ;;  %s854_s8 = smov (!%p658_p13), 0  }
 0x168   : > { %s858_s9 = smov (!%p658_p13), 0  }
 0x16c LB: >> { %v500_v52 = vld [vmem:[%s852_s7] sm:$0xff]  ;;  %s502_s18 = sadd.s32 1, %s856_s8  ;;  %s494_s9 = sadd.s32 1, %s860_s9   ;;  %s860_s9 = sphi %s858_s9, %s494_s9   ;;  %s856_s8 = sphi %s854_s8, %s855_s8   ;;  %s852_s7 = sphi %s850_s7, %s507_s7   ;;  %s848_s6 = sphi %s846_s6, %s508_s6  }
 0x16d   : >> { %501 = vst [vmem:[%s848_s6] sm:$0xff] %v500_v52  ;;  %p503_p0 = scmp.ge.s32.totalorder %s502_s18, %s986_s24  ;;  %p493_p1 = scmp.ge.s32.totalorder %s494_s9, %s986_s24 }
 0x16f   : >> { %s1019_s18 = smov (%p503_p0, %s502_s18), 0  ;;  %496 = sbr.rel (!%p493_p1) target bundleno = 364 (0x16c), region = 141 }
 0x170   : >> { %s659_s10 = sshll.u32 %s1019_s18, 3  ;;  %s855_s8 = smov %s1019_s18  }
 0x171   : >> { %s507_s7 = scalar_lea.vmem %s488_s28, %s659_s10 [#allocation2]   ;;  %s508_s6 = scalar_lea.vmem %s490_s30, %s659_s10  }
 0x174 PF: > { %p12_p2 = scmp.ge.s32.totalorder %s907_s22, 4   ;;  %s1011_s18 = smov %s824_s19 }
 0x175   : > { %s1012_s19 = smov %s915_s25  ;;  %s1013_s20 = smov %s907_s22 }
 0x176   :  { %14 = sbr.rel (!%p12_p2) target bundleno = 2 (0x2), region = 152 }

</bundles_post_ra>
